<compile_context>
chip_gen: v7x
topology: tpu7x:2x2x1
jax: 0.10.0
libtpu: 0.0.40
codegen_flags: <defaults>
</compile_context>

<pallas_src>
import functools

import jax
import jax.numpy as jnp
from jax import lax
from jax.experimental import pallas as pl
from jax.experimental.pallas import tpu as pltpu


def _captions_loss_kernel(w_ref, pred_ref, true_ref, num_ref, den_ref,
                          *, n_valid, padded):
    i = pl.program_id(1)          # step along the per-chunk reduction axis

    @pl.when(i == 0)
    def _():
        num_ref[...] = jnp.zeros_like(num_ref)
        den_ref[...] = jnp.zeros_like(den_ref)

    pred = pred_ref[...].astype(jnp.float32)   # (TN, D) logits
    tru = true_ref[...].astype(jnp.float32)    # (TN, D) "one-hot-ish" targets
    tn, d = pred.shape

    # target = argmax(cap_true, dim=-1): first-occurrence argmax as a one-hot.
    tmax = jnp.max(tru, axis=-1, keepdims=True)
    lane = lax.broadcasted_iota(jnp.int32, tru.shape, 1)
    idx = jnp.min(jnp.where(tru == tmax, lane, d), axis=-1, keepdims=True)
    one_hot = (lane == idx).astype(jnp.float32)                 # (TN, D)

    # Numerically-stable log-softmax evaluated only at the target lane.
    shifted = pred - jnp.max(pred, axis=-1, keepdims=True)
    lse = jnp.log(jnp.sum(jnp.exp(shifted), axis=-1, keepdims=True))
    tgt_logit = jnp.sum(one_hot * shifted, axis=-1, keepdims=True)
    nll = lse - tgt_logit                                       # (TN, 1)

    wts = jnp.sum(one_hot * w_ref[...], axis=-1, keepdims=True)  # (TN, 1)

    if padded:
        # Rows past n_valid are zero-padding added by the wrapper; zero their
        # weight so they contribute nothing to numerator or denominator.
        row0 = (pl.program_id(0) * pl.num_programs(1) + i) * tn
        rows = row0 + lax.broadcasted_iota(jnp.int32, (tn, 1), 0)
        wts = jnp.where(rows < n_valid, wts, 0.0)

    # Vector (per-row) partial sums accumulated in the grid-resident output
    # blocks; the single cross-sublane reduce happens once, in the wrapper.
    num_ref[...] += wts * nll
    den_ref[...] += wts


def _round_up(x, m):
    return ((x + m - 1) // m) * m


def captions_loss(cap_pred, cap_true, class_weights, weight=10.0, *,
                  tile_rows=None, num_chunks=None,
                  vmem_budget_bytes=6 * 1024 * 1024):
    """cap_pred, cap_true: (B, T, D); class_weights: (D,) float."""
    b, t, d = cap_pred.shape
    n = b * t

    # ---- grid / tile geometry --------------------------------------------
    if num_chunks is None:
        # Leading 'parallel' axis: lets the two TensorCores of a v7x chip
        # each take half of the rows; harmless on 1-TC v5e/v6e.
        num_chunks = 2 if n >= 16 else 1

    if tile_rows is None:
        # Double-buffered (pred + true) row tiles must fit the VMEM budget;
        # budget is taken in the *HBM* dtype (bf16 halves the traffic).
        itemsize = max(jnp.dtype(cap_pred.dtype).itemsize,
                       jnp.dtype(cap_true.dtype).itemsize)
        bytes_per_row = 2 * 2 * d * itemsize     # 2 inputs x 2 pipeline bufs
        tile_rows = max(8, min(1024, vmem_budget_bytes // bytes_per_row))
    tile_rows = max(8, (tile_rows // 8) * 8)
    rows_per_chunk = -(-n // num_chunks)
    tile_rows = min(tile_rows, _round_up(rows_per_chunk, 8))

    steps = -(-n // (num_chunks * tile_rows))
    n_pad = num_chunks * steps * tile_rows

    # ---- flatten (and pad rows only if the grid over-covers) --------------
    pred2d = cap_pred.reshape(n, d)              # keep HBM dtype (no upcast)
    true2d = cap_true.reshape(n, d)
    if n_pad != n:
        pred2d = jnp.pad(pred2d, ((0, n_pad - n), (0, 0)))
        true2d = jnp.pad(true2d, ((0, n_pad - n), (0, 0)))
    w2d = class_weights.reshape(1, d).astype(jnp.float32)

    kernel = functools.partial(_captions_loss_kernel,
                               n_valid=n, padded=(n_pad != n))

    # TODO(synk): for extremely large vocabularies (D >> 16k) a second grid
    # axis over D with an online max/log-sum-exp + running argmax would keep
    # row tiles wide; full-D rows are fine for typical caption vocab sizes.
    num_parts, den_parts = pl.pallas_call(
        kernel,
        out_shape=(
            jax.ShapeDtypeStruct((num_chunks * tile_rows, 1), jnp.float32),
            jax.ShapeDtypeStruct((num_chunks * tile_rows, 1), jnp.float32),
        ),
        grid_spec=pltpu.PrefetchScalarGridSpec(
            num_scalar_prefetch=0,
            grid=(num_chunks, steps),
            in_specs=[
                pl.BlockSpec((1, d), lambda c, i: (0, 0)),            # class weights (invariant)
                pl.BlockSpec((tile_rows, d),
                             lambda c, i: (c * steps + i, 0)),        # pred rows
                pl.BlockSpec((tile_rows, d),
                             lambda c, i: (c * steps + i, 0)),        # true rows
            ],
            out_specs=[
                pl.BlockSpec((tile_rows, 1), lambda c, i: (c, 0)),    # per-chunk num partials
                pl.BlockSpec((tile_rows, 1), lambda c, i: (c, 0)),    # per-chunk den partials
            ],
        ),
        compiler_params=pltpu.CompilerParams(
            dimension_semantics=("parallel", "arbitrary"),
            vmem_limit_bytes=32 * 1024 * 1024),
    )(w2d, pred2d, true2d)

    # F.cross_entropy with class weights is a weighted mean.
    num = jnp.sum(num_parts)
    den = jnp.sum(den_parts)
    return jnp.float32(weight) * (num / den)


def _reference_loss(cap_pred, cap_true, class_weights, weight=10.0):
    b, t, d = cap_pred.shape
    pred = cap_pred.reshape(b * t, d).astype(jnp.float32)
    target = jnp.argmax(cap_true.reshape(b * t, d).astype(jnp.float32), axis=-1)
    logp = jax.nn.log_softmax(pred, axis=-1)
    nll = -jnp.take_along_axis(logp, target[:, None], axis=-1)[:, 0]
    w = class_weights[target]
    return jnp.float32(weight) * jnp.sum(w * nll) / jnp.sum(w)


if __name__ == "__main__":
    key = jax.random.PRNGKey(0)
    k1, k2 = jax.random.split(key)

    B, T, D = 2, 8, 32  # batch, sequence length, vocab size
    cap_pred = jax.random.normal(k1, (B, T, D), dtype=jnp.float32)
    cap_true = jax.random.normal(k2, (B, T, D), dtype=jnp.float32)
    class_weights = jnp.linspace(0.5, 1.5, D, dtype=jnp.float32)

    loss = captions_loss(cap_pred, cap_true, class_weights, weight=10.0)
    jax.block_until_ready(loss)

    ref = _reference_loss(cap_pred, cap_true, class_weights, weight=10.0)
    assert jnp.allclose(loss, ref, rtol=1e-5, atol=1e-5), (loss, ref)

    print("KERNEL_OK")
</pallas_src>

<mosaic_0001>
module attributes {stable_mosaic.version = 11 : i64} {
  func.func @_captions_loss_kernel(%arg0: i32, %arg1: i32, %arg2: memref<1x32xf32, #tpu.memory_space<vmem>>, %arg3: memref<8x32xf32, #tpu.memory_space<vmem>>, %arg4: memref<8x32xf32, #tpu.memory_space<vmem>>, %arg5: memref<8x1xf32, #tpu.memory_space<vmem>>, %arg6: memref<8x1xf32, #tpu.memory_space<vmem>>) attributes {dimension_semantics = [#tpu.dimension_semantics<parallel>, #tpu.dimension_semantics<arbitrary>], iteration_bounds = array<i64: 2, 1>, scalar_prefetch = 0 : i64, scratch_operands = 0 : i64, tpu.core_type = #tpu.core_type<tc>, window_params = [{pipeline_mode = #tpu.pipeline_mode<synchronous>, transform_indices = @transform_0, window_bounds = array<i64: 1, 32>}, {transform_indices = @transform_1, window_bounds = array<i64: 8, 32>}, {transform_indices = @transform_2, window_bounds = array<i64: 8, 32>}, {transform_indices = @transform_3, window_bounds = array<i64: 8, 1>}, {transform_indices = @transform_4, window_bounds = array<i64: 8, 1>}]} {
    %c0_i32 = arith.constant 0 : i32
    %0 = arith.cmpi eq, %arg1, %c0_i32 : i32
    %1 = arith.extui %0 : i1 to i32
    %c0_i32_0 = arith.constant 0 : i32
    %2 = arith.cmpi ne, %1, %c0_i32_0 : i32
    scf.if %2 {
      %cst_19 = arith.constant 0.000000e+00 : f32
      %42 = vector.broadcast %cst_19 : f32 to vector<8x1xf32>
      %c0_20 = arith.constant 0 : index
      %c0_21 = arith.constant 0 : index
      %43 = vector.load %arg5[%c0_20, %c0_21] : memref<8x1xf32, #tpu.memory_space<vmem>>, vector<8x1xf32>
      tpu.vector_store %arg5[%c0_20, %c0_21], %42 {strides = array<i32>} : memref<8x1xf32, #tpu.memory_space<vmem>>, vector<8x1xf32>,
      %cst_22 = arith.constant 0.000000e+00 : f32
      %44 = vector.broadcast %cst_22 : f32 to vector<8x1xf32>
      %c0_23 = arith.constant 0 : index
      %c0_24 = arith.constant 0 : index
      %45 = vector.load %arg6[%c0_23, %c0_24] : memref<8x1xf32, #tpu.memory_space<vmem>>, vector<8x1xf32>
      tpu.vector_store %arg6[%c0_23, %c0_24], %44 {strides = array<i32>} : memref<8x1xf32, #tpu.memory_space<vmem>>, vector<8x1xf32>,
    } else {
    }
    %c0 = arith.constant 0 : index
    %c0_1 = arith.constant 0 : index
    %3 = vector.load %arg3[%c0, %c0_1] : memref<8x32xf32, #tpu.memory_space<vmem>>, vector<8x32xf32>
    %c0_2 = arith.constant 0 : index
    %c0_3 = arith.constant 0 : index
    %4 = vector.load %arg4[%c0_2, %c0_3] : memref<8x32xf32, #tpu.memory_space<vmem>>, vector<8x32xf32>
    %cst = arith.constant dense<0xFF800000> : vector<8xf32>
    %5 = vector.multi_reduction <maximumf>, %4, %cst [1] : vector<8x32xf32> to vector<8xf32>
    %6 = vector.shape_cast %5 : vector<8xf32> to vector<8x1xf32>
    %7 = tpu.iota {dimensions = array<i32: 1>} : vector<8x32xi32>
    %8 = vector.broadcast %6 : vector<8x1xf32> to vector<8x32xf32>
    %9 = arith.cmpf oeq, %4, %8 : vector<8x32xf32>
    %c32_i32 = arith.constant 32 : i32
    %10 = vector.broadcast %c32_i32 : i32 to vector<8x32xi32>
    %11 = arith.select %9, %7, %10 : vector<8x32xi1>, vector<8x32xi32>
    %cst_4 = arith.constant dense<2147483647> : vector<8xi32>
    %12 = vector.multi_reduction <minsi>, %11, %cst_4 [1] : vector<8x32xi32> to vector<8xi32>
    %13 = vector.shape_cast %12 : vector<8xi32> to vector<8x1xi32>
    %14 = vector.broadcast %13 : vector<8x1xi32> to vector<8x32xi32>
    %15 = arith.cmpi eq, %7, %14 : vector<8x32xi32>
    %16 = arith.extui %15 : vector<8x32xi1> to vector<8x32xi32>
    %17 = arith.sitofp %16 : vector<8x32xi32> to vector<8x32xf32>
    %cst_5 = arith.constant dense<0xFF800000> : vector<8xf32>
    %18 = vector.multi_reduction <maximumf>, %3, %cst_5 [1] : vector<8x32xf32> to vector<8xf32>
    %19 = vector.shape_cast %18 : vector<8xf32> to vector<8x1xf32>
    %20 = vector.broadcast %19 : vector<8x1xf32> to vector<8x32xf32>
    %21 = arith.subf %3, %20 : vector<8x32xf32>
    %22 = math.exp %21 : vector<8x32xf32>
    %cst_6 = arith.constant dense<0.000000e+00> : vector<8xf32>
    %23 = vector.multi_reduction <add>, %22, %cst_6 [1] : vector<8x32xf32> to vector<8xf32>
    %24 = vector.shape_cast %23 : vector<8xf32> to vector<8x1xf32>
    %25 = math.log %24 : vector<8x1xf32>
    %26 = arith.mulf %17, %21 : vector<8x32xf32>
    %cst_7 = arith.constant dense<0.000000e+00> : vector<8xf32>
    %27 = vector.multi_reduction <add>, %26, %cst_7 [1] : vector<8x32xf32> to vector<8xf32>
    %28 = vector.shape_cast %27 : vector<8xf32> to vector<8x1xf32>
    %29 = arith.subf %25, %28 : vector<8x1xf32>
    %c0_8 = arith.constant 0 : index
    %c0_9 = arith.constant 0 : index
    %30 = vector.load %arg2[%c0_8, %c0_9] : memref<1x32xf32, #tpu.memory_space<vmem>>, vector<1x32xf32>
    %31 = vector.broadcast %30 : vector<1x32xf32> to vector<8x32xf32>
    %32 = arith.mulf %17, %31 : vector<8x32xf32>
    %cst_10 = arith.constant dense<0.000000e+00> : vector<8xf32>
    %33 = vector.multi_reduction <add>, %32, %cst_10 [1] : vector<8x32xf32> to vector<8xf32>
    %34 = vector.shape_cast %33 : vector<8xf32> to vector<8x1xf32>
    %c0_11 = arith.constant 0 : index
    %c0_12 = arith.constant 0 : index
    %35 = vector.load %arg5[%c0_11, %c0_12] : memref<8x1xf32, #tpu.memory_space<vmem>>, vector<8x1xf32>
    %36 = arith.mulf %34, %29 : vector<8x1xf32>
    %37 = arith.addf %35, %36 : vector<8x1xf32>
    %c0_13 = arith.constant 0 : index
    %c0_14 = arith.constant 0 : index
    %38 = vector.load %arg5[%c0_13, %c0_14] : memref<8x1xf32, #tpu.memory_space<vmem>>, vector<8x1xf32>
    tpu.vector_store %arg5[%c0_13, %c0_14], %37 {strides = array<i32>} : memref<8x1xf32, #tpu.memory_space<vmem>>, vector<8x1xf32>,
    %c0_15 = arith.constant 0 : index
    %c0_16 = arith.constant 0 : index
    %39 = vector.load %arg6[%c0_15, %c0_16] : memref<8x1xf32, #tpu.memory_space<vmem>>, vector<8x1xf32>
    %40 = arith.addf %39, %34 : vector<8x1xf32>
    %c0_17 = arith.constant 0 : index
    %c0_18 = arith.constant 0 : index
    %41 = vector.load %arg6[%c0_17, %c0_18] : memref<8x1xf32, #tpu.memory_space<vmem>>, vector<8x1xf32>
    tpu.vector_store %arg6[%c0_17, %c0_18], %40 {strides = array<i32>} : memref<8x1xf32, #tpu.memory_space<vmem>>, vector<8x1xf32>,
    return
  }
  func.func @transform_0(%arg0: i32, %arg1: i32) -> (i32, i32) {
    %c0_i32 = arith.constant 0 : i32
    %c0_i32_0 = arith.constant 0 : i32
    %c0_i32_1 = arith.constant 0 : i32
    return %c0_i32, %c0_i32_0 : i32, i32
  }
  func.func @transform_1(%arg0: i32, %arg1: i32) -> (i32, i32) {
    %c1_i32 = arith.constant 1 : i32
    %0 = arith.muli %arg0, %c1_i32 : i32
    %1 = arith.addi %0, %arg1 : i32
    %c0_i32 = arith.constant 0 : i32
    %c0_i32_0 = arith.constant 0 : i32
    return %1, %c0_i32 : i32, i32
  }
  func.func @transform_2(%arg0: i32, %arg1: i32) -> (i32, i32) {
    %c1_i32 = arith.constant 1 : i32
    %0 = arith.muli %arg0, %c1_i32 : i32
    %1 = arith.addi %0, %arg1 : i32
    %c0_i32 = arith.constant 0 : i32
    %c0_i32_0 = arith.constant 0 : i32
    return %1, %c0_i32 : i32, i32
  }
  func.func @transform_3(%arg0: i32, %arg1: i32) -> (i32, i32) {
    %c0_i32 = arith.constant 0 : i32
    %c0_i32_0 = arith.constant 0 : i32
    return %arg0, %c0_i32 : i32, i32
  }
  func.func @transform_4(%arg0: i32, %arg1: i32) -> (i32, i32) {
    %c0_i32 = arith.constant 0 : i32
    %c0_i32_0 = arith.constant 0 : i32
    return %arg0, %c0_i32 : i32, i32
  }
}

</mosaic_0001>

<bundles_post_ra>
// kernel: tpu_custom_call.1
= control target key start
LH: loop header
LB: loop body
LE: loop exit
PB: predicated region body
PF: predicated region fallthrough
CT: control target
= control target key end

     0   :  { %10 = vsyncpa [#allocation3], 0  ;;  %s998_s0 = inlined_call_operand.hbm [shape: f32[1,32], index: 0, kind: input, shape index: {}]   ;;  %s999_s1 = inlined_call_operand.hbm [shape: f32[16,32], index: 1, kind: input, shape index: {}]   ;;  %s1000_s2 = inlined_call_operand.hbm [shape: f32[16,32], index: 2, kind: input, shape index: {}]   ;;  %s1001_s3 = inlined_call_operand.vmem [shape: f32[16,1], index: 3, kind: output, shape index: {0}]   ;;  %s1002_s4 = inlined_call_operand.vmem [shape: f32[16,1], index: 4, kind: output, shape index: {1}]  }
   0x1   :  { %11 = vsyncpa [#allocation5], 0 }
   0x2   :  { %13 = vsyncpa [#allocation5 + $0x1], 0  ;;  %s767_s15 = smov 0   ;;  %s769_s16 = smov 0  }
   0x3   :  { %s771_s17 = smov 0   ;;  %s773_s18 = smov 0  }
   0x4   :  { %s775_s19 = smov 0   ;;  %s777_s20 = smov 0  }
   0x5 LB: > { %s31_s21 = sadd.s32 1, %s732_s19  ;;  %s61_s22 = sadd.s32 1, %s724_s17  ;;  %s736_s20 = sphi %s777_s20, %s19_s20   ;;  %s732_s19 = sphi %s775_s19, %s1019_s19   ;;  %s728_s18 = sphi %s773_s18, %s1018_s18   ;;  %s724_s17 = sphi %s771_s17, %s1017_s17   ;;  %s720_s16 = sphi %s769_s16, %s1016_s16   ;;  %s716_s15 = sphi %s767_s15, %s1015_s15  }
   0x6   : > { %p33_p0 = scmp.ge.s32.totalorder %s31_s21, 2  ;;  %p68_p1 = scmp.ne.s32.totalorder %s724_s17, %s720_s16 }
   0x7   : > { %p69_p2 = scmp.eq.s32.totalorder %s736_s20, 0  ;;  %p538_p4 = scmp.lt.s32.totalorder %s736_s20, 2 }
   0x8   : > { %s1021_s21 = smov (%p33_p0, %s31_s21), 0  ;;  %s189_s24 = sand.u32 1, %s736_s20  }
   0x9   : > { %p70_p3 = por %p69_p2, %p68_p1  ;;  %s58_s23 = ssub.s32 %s732_s19, %s1021_s21 }
   0xa   : > { %p59_p5 = scmp.eq.s32.totalorder %s58_s23, 0  ;;  %s191_s25 = sand.u32 1, %s724_s17  }
   0xb   : > { %s505_s26 = sshll.u32 %s732_s19, 7  ;;  %s813_s28 = sshll.u32 %s191_s25, 3 }
   0xc   : > { %s811_s27 = scalar_select %p59_p5, %s724_s17, %s61_s22  }
   0xd   : > { %s820_s5 = scalar_lea.hbm %s999_s1, %s505_s26  ;;  %p822_p6 = pnand %p538_p4, %p70_p3 }
   0xe   : > { %s193_s7 = scalar_lea.vmem [#allocation4], %s813_s28  ;;  %s829_s9 = scalar_lea.sflag [#allocation5], %s189_s24 }
   0xf   : > { %s201_s8 = sshll.u32 %s193_s7, 4  ;;  %s594_s10 = scalar_lea.hbm %s820_s5, 128  ;;  %s827_s8 = int_to_ptr.vmem [resolvable:$true] %s201_s8 }
  0x10   : > { %p595_p7 = scmp.ne.s32.totalorder %s820_s5, %s594_s10  ;;  %p596_p8 = pneg %p822_p6 }
  0x11   : > { %s599_s13 = scalar_lea.hbm %s999_s1, 256  ;;  %p600_p11 = scmp.lt.u32.totalorder %s820_s5, %s999_s1 }
  0x12   : > { %p597_p9 = pnand %p596_p8, %p595_p7  ;;  %p601_p12 = scmp.lt.u32.totalorder %s599_s13, %s594_s10 }
  0x13   : > { %p603_p0 = scmp.lt.u32.totalorder %s594_s10, %s820_s5 }
  0x14   : > { %p598_p10 = pneg %p597_p9  ;;  %p602_p13 = por %p601_p12, %p600_p11 }
  0x16   : > { %p604_p1 = por %p603_p0, %p602_p13 }
  0x18   : > { %p605_p2 = pnand %p604_p1, %p598_p10 }
  0x1a   : > { %608 = shalt.err (!%p605_p2)
}
  0x1b   : > { %s609_s23 = scalar_lea.vmem %s827_s8, 128  ;;  %s738_s24 = smov [#allocation4]  }
  0x1c   : > { %p610_p3 = scmp.ne.s32.totalorder %s827_s8, %s609_s23  ;;  %s614_s25 = sshll.u32 %s738_s24, 4  ;;  %s615_s25 = int_to_ptr.vmem [resolvable:$false] %s614_s25 }
  0x1d   : > { %s616_s29 = scalar_lea.vmem %s615_s25, 256  ;;  %p617_p7 = scmp.lt.s32.totalorder %s827_s8, %s615_s25 }
  0x1e   : > { %p612_p4 = pnand %p610_p3, %p596_p8  ;;  %p618_p9 = scmp.lt.s32.totalorder %s616_s29, %s609_s23 }
  0x20   : > { %p613_p5 = pneg %p612_p4  ;;  %p619_p11 = por %p618_p9, %p617_p7 }
  0x22   : > { %p620_p12 = pnand %p619_p11, %p613_p5 }
  0x24   : > { %623 = shalt.err (!%p620_p12)
}
  0x25   : > { %533 = dma.hbm_to_vmem [thread:$0]  (!%p822_p6), %s820_s5, 128, %s827_s8, %s829_s9  }
  0x26   : > { %s499_s30 = sadd.s32 4294967295, %s736_s20   ;;  %p74_p10 = scmp.ne.s32.totalorder %s720_s16, %s716_s15 }
  0x27   : > { %p862_p13 = scmp.eq.s32.totalorder %s499_s30, 0  ;;  %p501_p0 = scmp.ge.s32.totalorder %s736_s20, 1 }
  0x28   : > { %p165_p1 = scmp.lt.s32.totalorder %s736_s20, 3  ;;  %s739_s15 = smov [#allocation2]  }
  0x29   : > { %s1008_s7 = scalar_select %p862_p13, 1, 0 }
  0x2a   : > { %p870_p2 = por %p862_p13, %p74_p10  ;;  %p874_p3 = pnand %p501_p0, %p165_p1 }
  0x2b   : > { %s178_s5 = sshll.u32 %s739_s15, 4  ;;  %s212_s8 = scalar_lea.vmem [#allocation6], %s813_s28  ;;  %s890_s5 = int_to_ptr.vmem [resolvable:$true] %s178_s5 }
  0x2c   : > { %s1009_s10 = scalar_select %p870_p2, 1, 0 }
  0x2d   : > { %s1010_s11 = scalar_select %p874_p3, 1, 0 }
  0x2e   : > { %s220_s12 = sshll.u32 %s212_s8, 4  ;;  %s884_s22 = scalar_lea.hbm %s1000_s2, %s505_s26  ;;  %s888_s12 = int_to_ptr.vmem [resolvable:$true] %s220_s12 }
  0x2f   : > { %p526_p4 = pneg %p874_p3  ;;  %s624_s23 = scalar_lea.hbm %s884_s22, 128 }
  0x30   : > { %p625_p7 = scmp.ne.s32.totalorder %s884_s22, %s624_s23  ;;  %s629_s25 = scalar_lea.hbm %s1000_s2, 256 }
  0x31   : > { %p894_p5 = pnand %p526_p4, %p862_p13  ;;  %p630_p12 = scmp.lt.u32.totalorder %s884_s22, %s1000_s2 }
  0x32   : > { %p627_p9 = pnand %p625_p7, %p596_p8  ;;  %p631_p10 = scmp.lt.u32.totalorder %s629_s25, %s624_s23 }
  0x33   : > { %p633_p1 = scmp.lt.u32.totalorder %s624_s23, %s884_s22 }
  0x34   : > { %p628_p11 = pneg %p627_p9  ;;  %p632_p0 = por %p631_p10, %p630_p12 }
  0x36   : > { %p634_p4 = por %p633_p1, %p632_p0 }
  0x38   : > { %p635_p2 = pnand %p634_p4, %p628_p11 }
  0x3a   : > { %638 = shalt.err (!%p635_p2)
}
  0x3b   : > { %s639_s8 = scalar_lea.vmem %s888_s12, 128  ;;  %s740_s13 = smov [#allocation6]  }
  0x3c   : > { %p640_p7 = scmp.ne.s32.totalorder %s888_s12, %s639_s8  ;;  %s644_s14 = sshll.u32 %s740_s13, 4  ;;  %s645_s14 = int_to_ptr.vmem [resolvable:$false] %s644_s14 }
  0x3d   : > { %s646_s26 = scalar_lea.vmem %s645_s14, 256  ;;  %p647_p3 = scmp.lt.s32.totalorder %s888_s12, %s645_s14 }
  0x3e   : > { %p642_p9 = pnand %p640_p7, %p596_p8  ;;  %p648_p12 = scmp.lt.s32.totalorder %s646_s26, %s639_s8 }
  0x40   : > { %p643_p13 = pneg %p642_p9  ;;  %p649_p10 = por %p648_p12, %p647_p3 }
  0x42   : > { %p650_p0 = pnand %p649_p10, %p643_p13 }
  0x44   : > { %653 = shalt.err (!%p650_p0)
}
  0x45   : > { %536 = dma.hbm_to_vmem [thread:$0]  (!%p822_p6), %s884_s22, 128, %s888_s12, %s829_s9  }
  0x46   : > { %s654_s25 = scalar_lea.hbm %s998_s0, 16  ;;  %p656_p2 = pneg %p894_p5 }
  0x47   : > { %p655_p8 = scmp.ne.s32.totalorder %s998_s0, %s654_s25  ;;  %p661_p11 = scmp.lt.u32.totalorder %s654_s25, %s998_s0 }
  0x49   : > { %p657_p3 = pnand %p656_p2, %p655_p8 }
  0x4b   : > { %p658_p13 = pneg %p657_p3 }
  0x4d   : > { %p663_p1 = pnand %p661_p11, %p658_p13 }
  0x4f   : > { %666 = shalt.err (!%p663_p1)
}
  0x50   : > { %s667_s6 = scalar_lea.vmem %s890_s5, 16  ;;  %s674_s9 = scalar_lea.vmem %s890_s5, 32 }
  0x51   : > { %p668_p6 = scmp.ne.s32.totalorder %s890_s5, %s667_s6  ;;  %p675_p9 = scmp.lt.s32.totalorder %s890_s5, %s890_s5 }
  0x52   : > { %p676_p12 = scmp.lt.s32.totalorder %s674_s9, %s667_s6 }
  0x53   : > { %p670_p4 = pnand %p668_p6, %p656_p2 }
  0x54   : > { %p677_p10 = por %p676_p12, %p675_p9 }
  0x55   : > { %p671_p7 = pneg %p670_p4 }
  0x57   : > { %p678_p0 = pnand %p677_p10, %p671_p7 }
  0x59   : > { %681 = shalt.err (!%p678_p0)
}
  0x5a   : > { %529 = dma.hbm_to_vmem [thread:$0]  (!%p894_p5), %s998_s0, 16, %s890_s5, [#allocation3]  }
  0x5b   : > { %p1012_p8 = scmp.ne.s32.totalorder %s1010_s11, 0 }
  0x5c   : > { %p1013_p2 = scmp.ne.s32.totalorder (!%p1012_p8), %s1008_s7, 0 }
  0x5d   : > { %229 = sbr.rel (%p1012_p8) target bundleno = 702 (0x2be), region = 32 }
  0x64   : > { %707 = dma.done.wait (%p1013_p2), [#allocation3], 16  }
  0x65   : > { %709 = vsyncadd (%p1013_p2), [#allocation3], 4294967280  ;;  %s235_s14 = sand.u32 1, %s499_s30   ;;  %s237_s28 = sand.u32 1, %s720_s16  }
  0x66   : > { %s510_s26 = sshll.u32 %s237_s28, 3  ;;  %s236_s23 = scalar_lea.sflag [#allocation5], %s235_s14 }
  0x67   : > { %s239_s24 = scalar_lea.vmem [#allocation4], %s510_s26  ;;  %p1014_p3 = scmp.ne.s32.totalorder %s1009_s10, 0 }
  0x69   : > { %711 = dma.done.wait (%p1014_p3), %s236_s23, 256  }
  0x6a   : > { %713 = vsyncadd (%p1014_p3), %s236_s23, 4294967040  ;;  %vm300_vm0 = vcmask 261120   ;;  %s248_s11 = scalar_lea.vmem [#allocation6], %s510_s26  ;;  %v298_v2 = vld [vmem:[%s239_s24] sm:$0xff]  ;;  %v304_v4 = vlaneseq  ;;  %p283_p5 = scmp.lt.s32.totalorder %s728_s18, 1  ;;  %vm295_vm3 = vcmask 7168  }
  0x6b   : > { %v299_v0 = vld [vmem:[%s248_s11] sm:$0xff]  ;;  %v326_v3 = vsel %vm300_vm0, %v298_v2, -inf  ;;  %v741_v20 = vmov 0.0  }
  0x6c   : > { %v301_v1 = vsel %vm300_vm0, %v299_v0, -inf  ;;  %327 = vmax.xlane.f32.xlu1 %v326_v3  ;;  %v305_v5 = vand.u32 127, %v304_v4  ;;  %s1023_s18 = smov (!%p283_p5, %s728_s18), 1  ;;  %v515_v26 = vld [vmem:[#allocation2] ss:$0 sm:$0xff] }
  0x6d   : > { %302 = vmax.xlane.f32.xlu0 %v301_v1  ;;  %s512_s30 = sshll.u32 %s1023_s18, 3 }
  0x6e   : > { %s966_s5 = scalar_lea.vmem %s1001_s3, %s512_s30  ;;  %s290_s15 = scalar_lea.vmem %s1002_s4, %s512_s30 }
  0x6f   : > { %296 = vst.msk [vmem:[%s966_s5] sm:$0xff] %vm295_vm3, %v741_v20  ;;  %297 = vst.msk [vmem:[%s290_s15] sm:$0xff] %vm295_vm3, %v741_v20 }
  0x76   : > { %v358_v35 = vld [vmem:[%s290_s15] sm:$0xff] }
  0x77   : > { %v353_v40 = vld [vmem:[%s966_s5] sm:$0xff] }
  0xf9   : > { %v328_v11 = vpop.xlane.xlu1 %327 }
  0xfa   : > { %v303_v6 = vpop.xlane.xlu0 %302  ;;  %v329_v12 = vsub.f32 %v298_v2, %v328_v11 }
  0xfb   : > { %vm306_vm1 = vcmp.eq.f32.partialorder %v299_v0, %v303_v6 }
  0xfc   : > { %v307_v7 = vsel %vm306_vm1, %v305_v5, 32  ;;  %v330_v13 = vmul.f32 1.442695, %v329_v12 }
  0xfd   : > { %v308_v8 = vsel %vm300_vm0, %v307_v7, 2147483647 }
  0xfe   : > { %v310_v9 = vshra.s32 %v308_v8, 16  ;;  %590 = vpow2.f32 %v330_v13  ;;  %v309_v16 = vand.u32 65535, %v308_v8 }
 0x100   : > { %v312_v10 = vcvt.s32.f32 %v310_v9  ;;  %v311_v18 = vcvt.s32.f32 %v309_v16 }
 0x102   : > { %313 = vmin.xlane.f32.xlu0 %v312_v10 }
 0x108   : > { %v591_v14 = vpop.eup %590 }
 0x109   : > { %v332_v15 = vsel %vm300_vm0, %v591_v14, 0.0 }
 0x10a   : > { %333 = vadd.xlane.f32.xlu0 %v332_v15 }
 0x18f   : > { %v314_v17 = vpop.xlane.xlu0 %313 }
 0x190   : > { %vm315_vm2 = vcmp.eq.f32.partialorder %v312_v10, %v314_v17  ;;  %v320_v21 = vcvt.f32.s32 %v314_v17 }
 0x191   : > { %v316_v19 = vsel %vm315_vm2, %v311_v18, inf }
 0x192   : > { %317 = vmin.xlane.f32.xlu1 %v316_v19  ;;  %v321_v23 = vshll.u32 %v320_v21, 16 }
 0x197   : > { %v334_v32 = vpop.xlane.xlu0 %333 }
 0x198   : > { %592 = vlog2.f32 %v334_v32 }
 0x1a2   : > { %v593_v33 = vpop.eup %592 }
 0x1a3   : > { %v336_v34 = vmul.f32 0.6931472, %v593_v33 }
 0x21f   : > { %v318_v22 = vpop.xlane.xlu1 %317 }
 0x220   : > { %v319_v24 = vcvt.f32.s32 %v318_v22 }
 0x222   : > { %v322_v25 = vadd.s32 %v321_v23, %v319_v24 }
 0x224   : > { %vm323_vm4 = vcmp.eq.s32.totalorder %v305_v5, %v322_v25 }
 0x225   : > { %v514_v27 = vsel %vm323_vm4, 1.0, %v741_v20 }
 0x226   : > { %v349_v28 = vmul.f32 %v515_v26, %v514_v27  ;;  %v337_v29 = vmul.f32 %v514_v27, %v329_v12 }
 0x228   : > { %v350_v30 = vsel %vm300_vm0, %v349_v28, 0.0  ;;  %v338_v31 = vsel %vm300_vm0, %v337_v29, 0.0 }
 0x229   : > { %351 = vadd.xlane.f32.xlu0 %v350_v30  ;;  %339 = vadd.xlane.f32.xlu1 %v338_v31 }
 0x2b6   : > { %v352_v36 = vpop.xlane.xlu0 %351  ;;  %v340_v37 = vpop.xlane.xlu1 %339 }
 0x2b7   : > { %v359_v38 = vadd.f32 %v358_v35, %v352_v36  ;;  %v341_v39 = vsub.f32 %v336_v34, %v340_v37 }
 0x2b9   : > { %360 = vst.msk [vmem:[%s290_s15] sm:$0xff] %vm295_vm3, %v359_v38  ;;  %v354_v41 = vmul.f32 %v352_v36, %v341_v39 }
 0x2bb   : > { %v355_v42 = vadd.f32 %v354_v41, %v353_v40 }
 0x2bd   : > { %357 = vst.msk [vmem:[%s966_s5] sm:$0xff] %vm295_vm3, %v355_v42 }
 0x2be PF: > { %s19_s20 = sadd.s32 1, %s736_s20   ;;  %s1015_s15 = smov %s720_s16 }
 0x2bf   : > { %p16_p13 = scmp.ge.s32.totalorder %s19_s20, 4   ;;  %s1016_s16 = smov %s724_s17 }
 0x2c0   : > { %s1017_s17 = smov %s811_s27  ;;  %s1018_s18 = smov %s732_s19 }
 0x2c1   : > { %s1019_s19 = smov %s1021_s21  ;;  %18 = sbr.rel (!%p16_p13) target bundleno = 5 (0x5), region = 104 }
 0x2c8   :  { %394 = vsyncpa [#allocation3], 1 }
 0x2c9   :  { %396 = vsyncpa [#allocation3 + $0x1], 1 }
 0x2ca   :  { %397 = vsyncpa [#allocation5], 1 }
 0x2cb   :  { %399 = vsyncpa [#allocation5 + $0x1], 1 }

</bundles_post_ra>
